<compile_context>
chip_gen: v6e
topology: v6e:2x2x1
jax: 0.10.0
libtpu: 0.0.40
codegen_flags: <defaults>
</compile_context>

<pallas_src>
import jax
import jax.numpy as jnp
from jax.experimental import pallas as pl
from jax.experimental.pallas import tpu as pltpu


# --------------------------------------------------------------------------
# Primary path: Identity.forward(x) == x is pure metadata.  No kernel, no HBM
# traffic, no launch overhead.  (Biggest win on every TPU generation.)
# --------------------------------------------------------------------------
def identity(x: jax.Array) -> jax.Array:
    return x


# --------------------------------------------------------------------------
# Kernel path (only if a materialized copy of x is mandated):
# one HBM->HBM DMA, no VMEM round-trip.
# --------------------------------------------------------------------------
def _identity_dma_kernel(x_hbm_ref, o_hbm_ref, sem):
    # Both refs live in HBM (memory_space=pl.ANY).  A single async copy moves
    # the whole buffer on the DMA engine at HBM roofline; no vector load/store
    # work and no VMEM footprint.  The DMA engine is independent of the
    # TensorCores, so a single descriptor saturates chip HBM bandwidth.
    cp = pltpu.make_async_copy(x_hbm_ref, o_hbm_ref, sem)
    cp.start()
    cp.wait()


def _identity_copy_dma(x: jax.Array) -> jax.Array:
    nbytes = int(x.size) * jnp.dtype(x.dtype).itemsize
    return pl.pallas_call(
        _identity_dma_kernel,
        out_shape=jax.ShapeDtypeStruct(x.shape, x.dtype),
        in_specs=[pl.BlockSpec(memory_space=pl.ANY)],
        out_specs=pl.BlockSpec(memory_space=pl.ANY),
        scratch_shapes=[pltpu.SemaphoreType.DMA],
        # Pure data movement: 0 flops, read + write of the full buffer.
        cost_estimate=pl.CostEstimate(
            flops=0, transcendentals=0, bytes_accessed=2 * nbytes
        ),
        # The output is written via a manual DMA; mark side effects so the
        # copy is never scheduled away.
        compiler_params=pltpu.CompilerParams(has_side_effects=True),
    )(x)


# --------------------------------------------------------------------------
# Fallback: classic VMEM-pipelined tiled copy (used only if the HBM->HBM DMA
# path fails to lower on some toolchain).  Tiling follows the review:
# lane-dense 128-multiple cols, ~6 MiB blocks, raised vmem_limit_bytes.
# --------------------------------------------------------------------------
_BLOCK_BYTES = 6 * 1024 * 1024        # 4x block (2 bufs x in+out) = 24 MiB
_VMEM_LIMIT = 48 * 1024 * 1024        # > 16/32 MiB scoped defaults, < 64 MiB
                                       # v7x physical, << 128 MiB v5e/v6e.


def _identity_vmem_kernel(x_ref, o_ref):
    o_ref[...] = x_ref[...]


def _lane_dense_cols(total: int, last_dim: int) -> int:
    """Widest 128-multiple column count dividing `total` (unmasked vst)."""
    for cols in (16384, 8192, 4096, 2048, 1024, 512, 256, 128):
        if total % cols == 0:
            return cols
    if total % 128 == 0:
        # Largest multiple-of-128 divisor up to 16384.
        best = 128
        for cols in range(256, min(total, 16384) + 1, 128):
            if total % cols == 0:
                best = cols
        return best
    # Ragged total: keep the original innermost dim (full-extent block is
    # always legal, just not lane-dense).
    return max(last_dim, 1)


def _identity_copy_vmem(x: jax.Array) -> jax.Array:
    orig_shape = x.shape
    dtype = x.dtype
    total = int(x.size)
    itemsize = jnp.dtype(dtype).itemsize
    # Packed sublane multiple per dtype width (f32: 8, bf16: 16, int8/fp8: 32).
    sublane = {4: 8, 2: 16, 1: 32}.get(itemsize, 8)

    last_dim = orig_shape[-1] if x.ndim >= 1 else 1
    cols = _lane_dense_cols(total, last_dim)
    rows = total // cols
    x2 = x.reshape(rows, cols)

    bytes_per_row = cols * itemsize
    block_rows = max(1, _BLOCK_BYTES // bytes_per_row)
    block_rows = max(sublane, (block_rows // sublane) * sublane)
    block_rows = min(block_rows, rows)

    grid = (pl.cdiv(rows, block_rows),)

    out2 = pl.pallas_call(
        _identity_vmem_kernel,
        out_shape=jax.ShapeDtypeStruct((rows, cols), dtype),
        grid_spec=pltpu.PrefetchScalarGridSpec(
            num_scalar_prefetch=0,
            grid=grid,
            in_specs=[pl.BlockSpec((block_rows, cols), lambda i: (i, 0))],
            out_specs=pl.BlockSpec((block_rows, cols), lambda i: (i, 0)),
        ),
        cost_estimate=pl.CostEstimate(
            flops=0, transcendentals=0, bytes_accessed=2 * total * itemsize
        ),
        compiler_params=pltpu.CompilerParams(
            # Parallel row axis: lets v7x's two TensorCores split the copy;
            # measured no-op on single-core v5e/v6e.
            dimension_semantics=("parallel",),
            vmem_limit_bytes=_VMEM_LIMIT,
        ),
    )(x2)
    return out2.reshape(orig_shape)


def identity_copy(x: jax.Array) -> jax.Array:
    """Materialized identity: fresh buffer bit-equal to x, via Pallas."""
    if x.size == 0:
        return x
    try:
        return _identity_copy_dma(x)
    except Exception:
        # Lowering fallback only; the DMA path is the intended fast path.
        return _identity_copy_vmem(x)


if __name__ == "__main__":
    key = jax.random.PRNGKey(0)
    # Small NCHW input consistent with the module's usage (image tensor).
    x = jax.random.normal(key, (2, 4, 16, 16), dtype=jnp.float32)

    # Faithful forward: pure short-circuit, zero HBM traffic.
    y = identity(x)
    assert y is x, "identity() must return the input unchanged"

    # Kernel path: run once, block, verify bit-exactness.
    y2 = identity_copy(x)
    jax.block_until_ready(y2)
    assert y2.shape == x.shape, f"shape mismatch: {y2.shape} vs {x.shape}"
    assert y2.dtype == x.dtype, f"dtype mismatch: {y2.dtype} vs {x.dtype}"
    assert bool(jnp.all(y2 == x)), "identity copy differs from input"

    print("KERNEL_OK")
</pallas_src>

<mosaic_0001>
module attributes {stable_mosaic.version = 11 : i64} {
  func.func @_identity_dma_kernel(%arg0: memref<2x4x16x16xf32, #tpu.memory_space<any>>, %arg1: memref<2x4x16x16xf32, #tpu.memory_space<any>>, %arg2: memref<!tpu.dma_semaphore, #tpu.memory_space<semaphore_mem>>) attributes {dimension_semantics = [], scalar_prefetch = 0 : i64, scratch_operands = 1 : i64, tpu.core_type = #tpu.core_type<tc>} {
    tpu.enqueue_dma source(%arg0 : memref<2x4x16x16xf32, #tpu.memory_space<any>>) target(%arg1 : memref<2x4x16x16xf32, #tpu.memory_space<any>>) target_semaphore(%arg2 : memref<!tpu.dma_semaphore, #tpu.memory_space<semaphore_mem>>)
    tpu.wait_dma2 semaphore(%arg2 : memref<!tpu.dma_semaphore, #tpu.memory_space<semaphore_mem>>) src(%arg0 : memref<2x4x16x16xf32, #tpu.memory_space<any>>) dst(%arg1 : memref<2x4x16x16xf32, #tpu.memory_space<any>>)
    return
  }
}

module attributes {stable_mosaic.version = 11 : i64} {
  func.func @_identity_vmem_kernel(%arg0: i32, %arg1: memref<1x2048xf32, #tpu.memory_space<vmem>>, %arg2: memref<1x2048xf32, #tpu.memory_space<vmem>>) attributes {dimension_semantics = [#tpu.dimension_semantics<parallel>], iteration_bounds = array<i64: 1>, scalar_prefetch = 0 : i64, scratch_operands = 0 : i64, tpu.core_type = #tpu.core_type<tc>, window_params = [{transform_indices = @transform_0, window_bounds = array<i64: 1, 2048>}, {transform_indices = @transform_1, window_bounds = array<i64: 1, 2048>}]} {
    %c0 = arith.constant 0 : index
    %c0_0 = arith.constant 0 : index
    %0 = vector.load %arg1[%c0, %c0_0] : memref<1x2048xf32, #tpu.memory_space<vmem>>, vector<1x2048xf32>
    %c0_1 = arith.constant 0 : index
    %c0_2 = arith.constant 0 : index
    %1 = vector.load %arg2[%c0_1, %c0_2] : memref<1x2048xf32, #tpu.memory_space<vmem>>, vector<1x2048xf32>
    tpu.vector_store %arg2[%c0_1, %c0_2], %0 {strides = array<i32>} : memref<1x2048xf32, #tpu.memory_space<vmem>>, vector<1x2048xf32>,
    return
  }
  func.func @transform_0(%arg0: i32) -> (i32, i32) {
    %c0_i32 = arith.constant 0 : i32
    %c0_i32_0 = arith.constant 0 : i32
    return %arg0, %c0_i32 : i32, i32
  }
  func.func @transform_1(%arg0: i32) -> (i32, i32) {
    %c0_i32 = arith.constant 0 : i32
    %c0_i32_0 = arith.constant 0 : i32
    return %arg0, %c0_i32 : i32, i32
  }
}

</mosaic_0001>

<bundles_post_ra>
// kernel: tpu_custom_call.1
= control target key start
LH: loop header
LB: loop body
LE: loop exit
PB: predicated region body
PF: predicated region fallthrough
CT: control target
= control target key end

     0   :  { %s30_s6 = smov [#allocation2]   ;;  %s31_s7 = smov 131072   ;;  %s49_s0 = inlined_call_operand.hbm [shape: f32[2,4,16,16], index: 0, kind: input, shape index: {}]   ;;  %s50_s1 = inlined_call_operand.hbm [shape: f32[2,4,16,16], index: 1, kind: output, shape index: {}]  }
   0x1   :  { %s32_s8 = smov 0  }
   0x2   :  { %12 = dma.general %s49_s0, 2048, %s50_s1, %s30_s6, %s31_s7, [#allocation4], %s32_s8, 0  }
   0x3   :  { %28 = dma.done.wait [#allocation2], 2048 }
   0x4   :  { %29 = vsyncadd [#allocation2], 4294965248 }
   0x5   :  { %18 = vsyncmov [#allocation2] }
   0x8   :  { %s19_s13 = vpop.sfrf %18 }
   0x9   :  { %p24_p0 = scmp.ne.s32.totalorder %s19_s13, 0 }
   0xb   :  { %23 = shalt.err (%p24_p0)  }

// kernel: tpu_custom_call.1
= control target key start
LH: loop header
LB: loop body
LE: loop exit
PB: predicated region body
PF: predicated region fallthrough
CT: control target
= control target key end

     0   :  { %6 = vsyncpa [#allocation3], 0  ;;  %s104_s0 = inlined_call_operand.hbm [shape: f32[1,2048], index: 0, kind: input, shape index: {}]   ;;  %s105_s1 = inlined_call_operand.hbm [shape: f32[1,2048], index: 1, kind: output, shape index: {}]  }
   0x1   :  { %7 = vsyncpa [#allocation4], 0  ;;  %s86_s6 = smov [#allocation2]  }
   0x2   :  { %s14_s7 = sshll.u32 %s86_s6, 4  ;;  %s15_s7 = int_to_ptr.vmem [resolvable:$true] %s14_s7 }
   0x3   :  { %s50_s8 = scalar_lea.vmem %s15_s7, 256  ;;  %p55_p1 = scmp.lt.s32.totalorder %s15_s7, %s15_s7 }
   0x4   :  { %p51_p0 = scmp.ne.s32.totalorder %s15_s7, %s50_s8  ;;  %p56_p2 = scmp.lt.s32.totalorder %s50_s8, %s50_s8 }
   0x6   :  { %p57_p3 = por %p56_p2, %p55_p1 }
   0x8   :  { %p58_p4 = pnand %p57_p3, %p51_p0 }
   0xa   :  { %61 = shalt.err (!%p58_p4)
}
   0xb   :  { %17 = dma.hbm_to_vmem [thread:$0]  %s104_s0, 256, %s15_s7, [#allocation3]  }
   0xc   :  { %82 = dma.done.wait [#allocation3], 256  }
   0xd   :  { %83 = vsyncadd [#allocation3], 4294967040  ;;  %s87_s11 = smov [#allocation5]   ;;  %v21_v0 = vld [vmem:[#allocation2] sm:$0xff]  ;;  %v22_v1 = vld [vmem:[#allocation2 + $0x8] sm:$0xff] }
   0xe   :  { %s31_s12 = sshll.u32 %s87_s11, 4  ;;  %23 = vst [vmem:[#allocation5] sm:$0xff] %v21_v0  ;;  %24 = vst [vmem:[#allocation5 + $0x8] sm:$0xff] %v22_v1  ;;  %s32_s12 = int_to_ptr.vmem [resolvable:$true] %s31_s12 }
   0xf   :  { %s62_s13 = scalar_lea.vmem %s32_s12, 256  ;;  %p67_p6 = scmp.lt.s32.totalorder %s32_s12, %s32_s12 }
  0x10   :  { %p63_p5 = scmp.ne.s32.totalorder %s32_s12, %s62_s13  ;;  %p68_p7 = scmp.lt.s32.totalorder %s62_s13, %s62_s13 }
  0x12   :  { %p69_p8 = por %p68_p7, %p67_p6 }
  0x14   :  { %p70_p9 = pnand %p69_p8, %p63_p5 }
  0x16   :  { %73 = shalt.err (!%p70_p9)
}
  0x17   :  { %34 = dma.vmem_to_hbm [thread:$0]  %s32_s12, 256, %s105_s1, [#allocation4]  }
  0x18   :  { %84 = dma.done.wait [#allocation4], 256  }
  0x19   :  { %85 = vsyncadd [#allocation4], 4294967040 }
  0x1a   :  { %38 = vsyncpa [#allocation3], 1 }
  0x1b   :  { %39 = vsyncpa [#allocation4], 1 }

</bundles_post_ra>
